<compile_context>
chip_gen: v6e
topology: v6e:2x2x1
jax: 0.10.0
libtpu: 0.0.40
codegen_flags: <defaults>
</compile_context>

<pallas_src>
import math
import numpy as np
import jax
import jax.numpy as jnp
from jax.experimental import pallas as pl
from jax.experimental.pallas import tpu as pltpu

_EPS = 1e-5
_HP = jax.lax.Precision.HIGHEST   # used only in the pure-JAX reference


# --------------------------------------------------------------------------- #
# Pallas kernel factory: whole ResBlock forward on (C, rows) matrices,
# rows ordered window-position-major and padded to a multiple of 128.
# --------------------------------------------------------------------------- #
def _make_resblock_kernel(c_in, c_out, inv_n):
    # Static column offsets into the packed parameter matrix (C_out, K):
    #   [ w1^T | w2^T | ws^T | g1 | g2 | bt2 | gs | bts ]
    o_w1 = 0
    o_w2 = o_w1 + c_in
    o_ws = o_w2 + c_out
    o_g1 = o_ws + c_in
    o_g2, o_bt2, o_gs, o_bts = o_g1 + 1, o_g1 + 2, o_g1 + 3, o_g1 + 4

    def kernel(x_ref, p_ref, o_ref):
        x = x_ref[...]                       # (C_in, 4*Rout_pad), rows on lanes
        p = p_ref[...]                       # (C_out, K) packed params

        w1_t = p[:, o_w1:o_w1 + c_in]        # (C_out, C_in)
        w2_t = p[:, o_w2:o_w2 + c_out]       # (C_out, C_out)
        ws_t = p[:, o_ws:o_ws + c_in]        # (C_out, C_in)
        g1 = p[:, o_g1:o_g1 + 1]
        g2 = p[:, o_g2:o_g2 + 1]
        bt2 = p[:, o_bt2:o_bt2 + 1]
        gs = p[:, o_gs:o_gs + 1]
        bts = p[:, o_bts:o_bts + 1]

        def conv1x1(h, w_t, col_scale=None):
            # h: (Cin, R), w_t: (Cout, Cin).  1x1 conv == per-input-channel
            # broadcast-FMA on the VPU.  Optional col_scale (Cin, 1) folds a
            # preceding per-channel BN scale into the weights (O(Cin*Cout)).
            cin = h.shape[0]
            acc = None
            for ci in range(cin):
                w_col = w_t[:, ci:ci + 1]                     # (Cout, 1)
                if col_scale is not None:
                    w_col = w_col * col_scale[ci:ci + 1, :]   # (Cout,1)*(1,1)
                term = w_col * h[ci:ci + 1, :]                # (Cout, R)
                acc = term if acc is None else acc + term
            return acc

        def bn_stats(h):
            # Padded rows are exactly zero, so they add nothing to the sums;
            # inv_n is 1 / (true element count), making the stats exact.
            s1 = jnp.sum(h, axis=1, keepdims=True)            # (C, 1)  XLU
            s2 = jnp.sum(h * h, axis=1, keepdims=True)        # (C, 1)
            mean = s1 * inv_n
            var = jnp.maximum(s2 * inv_n - mean * mean, 0.0)
            return mean, var

        def bn_affine(h, gamma, beta):
            mean, var = bn_stats(h)
            a = gamma * jax.lax.rsqrt(var + _EPS)             # EUP rsqrt
            b = beta - mean * a
            return h * a + b

        def lrelu(h):
            return jnp.maximum(h, 0.1 * h)                    # single vmax

        def maxpool(h):
            # Rows are window-position-major: block q (of 4) holds pixel
            # (2*io+di, 2*jo+dj) for q = 2*di+dj, each block Rout_pad wide
            # (multiple of 128 -> lane-aligned slices, unmasked stores).
            r = h.shape[1] // 4
            m01 = jnp.maximum(h[:, 0 * r:1 * r], h[:, 1 * r:2 * r])
            m23 = jnp.maximum(h[:, 2 * r:3 * r], h[:, 3 * r:4 * r])
            return jnp.maximum(m01, m23)                      # (C, Rout_pad)

        # ---- residual: conv1 -> (BN1 folded into conv2) -> conv2 -> BN2 ----
        h1 = conv1x1(x, w1_t)
        mean1, var1 = bn_stats(h1)
        a1 = g1 * jax.lax.rsqrt(var1 + _EPS)   # (C_out,1); beta1 / bias terms
        #                                        cancel exactly in BN2's mean sub
        h2 = conv1x1(h1, w2_t, col_scale=a1)
        r = bn_affine(h2, g2, bt2)

        # ---- shortcut: conv -> BN ----
        s = bn_affine(conv1x1(x, ws_t), gs, bts)

        # ---- pool first, then LReLU (they commute), then add ----
        o_ref[...] = lrelu(maxpool(r)) + lrelu(maxpool(s))

    return kernel


# --------------------------------------------------------------------------- #
# Wrapper (layout plumbing + single-block pallas_call).
# --------------------------------------------------------------------------- #
@jax.jit
def resblock_pallas(x_nchw, params):
    N, C_in, H, W = x_nchw.shape
    C_out = params["w1"].shape[1]
    assert H % 2 == 0 and W % 2 == 0, "MaxPool2d(2) floor behavior not handled"
    Ho, Wo = H // 2, W // 2
    Rout = N * Ho * Wo
    Rout_pad = max(128, ((Rout + 127) // 128) * 128)   # lane-dense output
    inv_n = 1.0 / float(4 * Rout)                      # TRUE element count

    # NCHW -> (C_in, 4, Rout) with window-position-major row order:
    #   block q = 2*di+dj holds pixel (2*io+di, 2*jo+dj) at row n*Ho*Wo+io*Wo+jo
    x6 = x_nchw.reshape(N, C_in, Ho, 2, Wo, 2)                  # (n,c,io,di,jo,dj)
    x_t = jnp.transpose(x6, (1, 3, 5, 0, 2, 4)).reshape(C_in, 4, Rout)
    if Rout_pad != Rout:
        x_t = jnp.pad(x_t, ((0, 0), (0, 0), (0, Rout_pad - Rout)))
    x_t = x_t.reshape(C_in, 4 * Rout_pad).astype(jnp.float32)

    # Pack all parameters into one (C_out, K) matrix.  bt1 is omitted: it is
    # exactly cancelled by BN2's mean subtraction once BN1 is folded into W2.
    col = lambda v: v.reshape(C_out, 1)
    packed = jnp.concatenate(
        [params["w1"].T, params["w2"].T, params["ws"].T,
         col(params["g1"]), col(params["g2"]), col(params["bt2"]),
         col(params["gs"]), col(params["bts"])],
        axis=1).astype(jnp.float32)

    kernel = _make_resblock_kernel(C_in, C_out, inv_n)

    out_t = pl.pallas_call(
        kernel,
        out_shape=jax.ShapeDtypeStruct((C_out, Rout_pad), jnp.float32),
        grid=(1,),
        in_specs=[pl.BlockSpec(x_t.shape, lambda i: (0, 0)),
                  pl.BlockSpec(packed.shape, lambda i: (0, 0))],
        out_specs=pl.BlockSpec((C_out, Rout_pad), lambda i: (0, 0)),
        compiler_params=pltpu.CompilerParams(
            dimension_semantics=("arbitrary",),
            allow_input_fusion=[True, True],
            vmem_limit_bytes=32 * 1024 * 1024),
    )(x_t, packed)

    # (C_out, Rout_pad) -> drop padding -> (C_out, N, Ho, Wo) -> NCHW
    out_t = out_t[:, :Rout]
    return jnp.transpose(out_t.reshape(C_out, N, Ho, Wo), (1, 0, 2, 3))


# --------------------------------------------------------------------------- #
# Deterministic parameter init (mirrors res_arch_init: xavier_uniform with
# gain sqrt(2) for 'residual' convs, gain 1.0 for 'shortcut'; conv biases are
# zero-initialized AND mathematically cancelled by the following BatchNorm, so
# they are omitted; BatchNorm gamma=1, beta=0).
# --------------------------------------------------------------------------- #
def init_resblock_params(key, c_in, c_out):
    def xavier(k, fan_in, fan_out, gain):
        bound = gain * math.sqrt(6.0 / (fan_in + fan_out))
        # stored as (C_in, C_out); the wrapper transposes for the kernel.
        return jax.random.uniform(k, (fan_in, fan_out), jnp.float32, -bound, bound)

    k1, k2, k3 = jax.random.split(key, 3)
    ones = jnp.ones((c_out,), jnp.float32)
    zeros = jnp.zeros((c_out,), jnp.float32)
    return {
        # residual convs: gain sqrt(2)
        "w1": xavier(k1, c_in, c_out, math.sqrt(2.0)), "g1": ones, "bt1": zeros,
        "w2": xavier(k2, c_out, c_out, math.sqrt(2.0)), "g2": ones, "bt2": zeros,
        # shortcut conv: gain 1.0
        "ws": xavier(k3, c_in, c_out, 1.0), "gs": ones, "bts": zeros,
    }


# --------------------------------------------------------------------------- #
# Pure-JAX reference (NCHW, same math as the PyTorch module) for sanity checks.
# --------------------------------------------------------------------------- #
def resblock_reference(x, p):
    def conv1x1(h, w):  # w: (C_in, C_out); bias is zero / cancelled by BN
        return jnp.einsum("nchw,co->nohw", h, w, precision=_HP)

    def bn(h, g, bt):
        mean = h.mean(axis=(0, 2, 3), keepdims=True)
        var = ((h - mean) ** 2).mean(axis=(0, 2, 3), keepdims=True)
        return (h - mean) / jnp.sqrt(var + _EPS) * g[None, :, None, None] \
            + bt[None, :, None, None]

    def lrelu(h):
        return jnp.where(h >= 0, h, 0.1 * h)

    def pool(h):
        n, c, hh, ww = h.shape
        return h.reshape(n, c, hh // 2, 2, ww // 2, 2).max(axis=(3, 5))

    r = bn(conv1x1(x, p["w1"]), p["g1"], p["bt1"])
    r = pool(lrelu(bn(conv1x1(r, p["w2"]), p["g2"], p["bt2"])))
    s = pool(lrelu(bn(conv1x1(x, p["ws"]), p["gs"], p["bts"])))
    return r + s


if __name__ == "__main__":
    # ---- main test: ResBlock(4, 8, down=True), module-faithful init ----
    N, C_IN, C_OUT, H, W = 2, 4, 8, 16, 16

    key = jax.random.PRNGKey(0)
    kx, kp = jax.random.split(key)
    x = jax.random.normal(kx, (N, C_IN, H, W), jnp.float32)   # NCHW, like torch
    params = init_resblock_params(kp, C_IN, C_OUT)

    out = jax.block_until_ready(resblock_pallas(x, params))
    ref = jax.block_until_ready(resblock_reference(x, params))
    assert out.shape == (N, C_OUT, H // 2, W // 2), out.shape
    np.testing.assert_allclose(np.asarray(out), np.asarray(ref), rtol=1e-3, atol=1e-3)

    # ---- second test: exercises the Rout<128 padding path and random BN
    # gammas/betas (validates the BN1-into-conv2 fold and fused affine) ----
    N2, H2, W2 = 1, 10, 10
    keys = jax.random.split(jax.random.PRNGKey(1), 8)
    x2 = jax.random.normal(keys[0], (N2, C_IN, H2, W2), jnp.float32)
    p2 = init_resblock_params(keys[1], C_IN, C_OUT)
    p2 = dict(p2)
    p2["g1"] = 1.0 + 0.2 * jax.random.normal(keys[2], (C_OUT,), jnp.float32)
    p2["bt1"] = 0.3 * jax.random.normal(keys[3], (C_OUT,), jnp.float32)  # cancelled exactly
    p2["g2"] = 1.0 + 0.2 * jax.random.normal(keys[4], (C_OUT,), jnp.float32)
    p2["bt2"] = 0.3 * jax.random.normal(keys[5], (C_OUT,), jnp.float32)
    p2["gs"] = 1.0 + 0.2 * jax.random.normal(keys[6], (C_OUT,), jnp.float32)
    p2["bts"] = 0.3 * jax.random.normal(keys[7], (C_OUT,), jnp.float32)

    out2 = jax.block_until_ready(resblock_pallas(x2, p2))
    ref2 = jax.block_until_ready(resblock_reference(x2, p2))
    assert out2.shape == (N2, C_OUT, H2 // 2, W2 // 2), out2.shape
    np.testing.assert_allclose(np.asarray(out2), np.asarray(ref2), rtol=1e-3, atol=1e-3)

    print("KERNEL_OK")
</pallas_src>

<mosaic_0001>
module attributes {stable_mosaic.version = 11 : i64} {
  func.func @kernel(%arg0: i32, %arg1: memref<4x512xf32, #tpu.memory_space<vmem>>, %arg2: memref<8x21xf32, #tpu.memory_space<vmem>>, %arg3: memref<8x128xf32, #tpu.memory_space<vmem>>) attributes {dimension_semantics = [#tpu.dimension_semantics<arbitrary>], iteration_bounds = array<i64: 1>, scalar_prefetch = 0 : i64, scratch_operands = 0 : i64, tpu.core_type = #tpu.core_type<tc>, window_params = [{pipeline_mode = #tpu.pipeline_mode<synchronous>, transform_indices = @transform_0, window_bounds = array<i64: 4, 512>}, {pipeline_mode = #tpu.pipeline_mode<synchronous>, transform_indices = @transform_1, window_bounds = array<i64: 8, 21>}, {pipeline_mode = #tpu.pipeline_mode<synchronous>, transform_indices = @transform_2, window_bounds = array<i64: 8, 128>}]} {
    %c0 = arith.constant 0 : index
    %c0_0 = arith.constant 0 : index
    %0 = vector.load %arg1[%c0, %c0_0] : memref<4x512xf32, #tpu.memory_space<vmem>>, vector<4x512xf32>
    %c0_1 = arith.constant 0 : index
    %c0_2 = arith.constant 0 : index
    %1 = vector.load %arg2[%c0_1, %c0_2] : memref<8x21xf32, #tpu.memory_space<vmem>>, vector<8x21xf32>
    %2 = vector.extract_strided_slice %1 {offsets = [0, 0], sizes = [8, 4], strides = [1, 1]} : vector<8x21xf32> to vector<8x4xf32>
    %3 = vector.extract_strided_slice %1 {offsets = [0, 4], sizes = [8, 8], strides = [1, 1]} : vector<8x21xf32> to vector<8x8xf32>
    %4 = vector.extract_strided_slice %1 {offsets = [0, 12], sizes = [8, 4], strides = [1, 1]} : vector<8x21xf32> to vector<8x4xf32>
    %5 = vector.extract_strided_slice %1 {offsets = [0, 16], sizes = [8, 1], strides = [1, 1]} : vector<8x21xf32> to vector<8x1xf32>
    %6 = vector.extract_strided_slice %1 {offsets = [0, 17], sizes = [8, 1], strides = [1, 1]} : vector<8x21xf32> to vector<8x1xf32>
    %7 = vector.extract_strided_slice %1 {offsets = [0, 18], sizes = [8, 1], strides = [1, 1]} : vector<8x21xf32> to vector<8x1xf32>
    %8 = vector.extract_strided_slice %1 {offsets = [0, 19], sizes = [8, 1], strides = [1, 1]} : vector<8x21xf32> to vector<8x1xf32>
    %9 = vector.extract_strided_slice %1 {offsets = [0, 20], sizes = [8, 1], strides = [1, 1]} : vector<8x21xf32> to vector<8x1xf32>
    %10 = vector.extract_strided_slice %2 {offsets = [0, 0], sizes = [8, 1], strides = [1, 1]} : vector<8x4xf32> to vector<8x1xf32>
    %11 = vector.extract_strided_slice %0 {offsets = [0, 0], sizes = [1, 512], strides = [1, 1]} : vector<4x512xf32> to vector<1x512xf32>
    %12 = vector.broadcast %10 : vector<8x1xf32> to vector<8x512xf32>
    %13 = vector.broadcast %11 : vector<1x512xf32> to vector<8x512xf32>
    %14 = arith.mulf %12, %13 : vector<8x512xf32>
    %15 = vector.extract_strided_slice %2 {offsets = [0, 1], sizes = [8, 1], strides = [1, 1]} : vector<8x4xf32> to vector<8x1xf32>
    %16 = vector.extract_strided_slice %0 {offsets = [1, 0], sizes = [1, 512], strides = [1, 1]} : vector<4x512xf32> to vector<1x512xf32>
    %17 = vector.broadcast %15 : vector<8x1xf32> to vector<8x512xf32>
    %18 = vector.broadcast %16 : vector<1x512xf32> to vector<8x512xf32>
    %19 = arith.mulf %17, %18 : vector<8x512xf32>
    %20 = arith.addf %14, %19 : vector<8x512xf32>
    %21 = vector.extract_strided_slice %2 {offsets = [0, 2], sizes = [8, 1], strides = [1, 1]} : vector<8x4xf32> to vector<8x1xf32>
    %22 = vector.extract_strided_slice %0 {offsets = [2, 0], sizes = [1, 512], strides = [1, 1]} : vector<4x512xf32> to vector<1x512xf32>
    %23 = vector.broadcast %21 : vector<8x1xf32> to vector<8x512xf32>
    %24 = vector.broadcast %22 : vector<1x512xf32> to vector<8x512xf32>
    %25 = arith.mulf %23, %24 : vector<8x512xf32>
    %26 = arith.addf %20, %25 : vector<8x512xf32>
    %27 = vector.extract_strided_slice %2 {offsets = [0, 3], sizes = [8, 1], strides = [1, 1]} : vector<8x4xf32> to vector<8x1xf32>
    %28 = vector.extract_strided_slice %0 {offsets = [3, 0], sizes = [1, 512], strides = [1, 1]} : vector<4x512xf32> to vector<1x512xf32>
    %29 = vector.broadcast %27 : vector<8x1xf32> to vector<8x512xf32>
    %30 = vector.broadcast %28 : vector<1x512xf32> to vector<8x512xf32>
    %31 = arith.mulf %29, %30 : vector<8x512xf32>
    %32 = arith.addf %26, %31 : vector<8x512xf32>
    %cst = arith.constant dense<0.000000e+00> : vector<8xf32>
    %33 = vector.multi_reduction <add>, %32, %cst [1] : vector<8x512xf32> to vector<8xf32>
    %34 = vector.shape_cast %33 : vector<8xf32> to vector<8x1xf32>
    %35 = arith.mulf %32, %32 : vector<8x512xf32>
    %cst_3 = arith.constant dense<0.000000e+00> : vector<8xf32>
    %36 = vector.multi_reduction <add>, %35, %cst_3 [1] : vector<8x512xf32> to vector<8xf32>
    %37 = vector.shape_cast %36 : vector<8xf32> to vector<8x1xf32>
    %cst_4 = arith.constant 0.001953125 : f32
    %38 = vector.broadcast %cst_4 : f32 to vector<8x1xf32>
    %39 = arith.mulf %34, %38 : vector<8x1xf32>
    %cst_5 = arith.constant 0.001953125 : f32
    %40 = vector.broadcast %cst_5 : f32 to vector<8x1xf32>
    %41 = arith.mulf %37, %40 : vector<8x1xf32>
    %42 = arith.mulf %39, %39 : vector<8x1xf32>
    %43 = arith.subf %41, %42 : vector<8x1xf32>
    %cst_6 = arith.constant 0.000000e+00 : f32
    %44 = vector.broadcast %cst_6 : f32 to vector<8x1xf32>
    %45 = arith.maximumf %43, %44 : vector<8x1xf32>
    %cst_7 = arith.constant 9.99999974E-6 : f32
    %46 = vector.broadcast %cst_7 : f32 to vector<8x1xf32>
    %47 = arith.addf %45, %46 : vector<8x1xf32>
    %48 = math.rsqrt %47 : vector<8x1xf32>
    %49 = arith.mulf %5, %48 : vector<8x1xf32>
    %50 = vector.extract_strided_slice %3 {offsets = [0, 0], sizes = [8, 1], strides = [1, 1]} : vector<8x8xf32> to vector<8x1xf32>
    %51 = vector.extract_strided_slice %49 {offsets = [0, 0], sizes = [1, 1], strides = [1, 1]} : vector<8x1xf32> to vector<1x1xf32>
    %52 = vector.broadcast %51 : vector<1x1xf32> to vector<8x1xf32>
    %53 = arith.mulf %50, %52 : vector<8x1xf32>
    %54 = vector.extract_strided_slice %32 {offsets = [0, 0], sizes = [1, 512], strides = [1, 1]} : vector<8x512xf32> to vector<1x512xf32>
    %55 = vector.broadcast %53 : vector<8x1xf32> to vector<8x512xf32>
    %56 = vector.broadcast %54 : vector<1x512xf32> to vector<8x512xf32>
    %57 = arith.mulf %55, %56 : vector<8x512xf32>
    %58 = vector.extract_strided_slice %3 {offsets = [0, 1], sizes = [8, 1], strides = [1, 1]} : vector<8x8xf32> to vector<8x1xf32>
    %59 = vector.extract_strided_slice %49 {offsets = [1, 0], sizes = [1, 1], strides = [1, 1]} : vector<8x1xf32> to vector<1x1xf32>
    %60 = vector.broadcast %59 : vector<1x1xf32> to vector<8x1xf32>
    %61 = arith.mulf %58, %60 : vector<8x1xf32>
    %62 = vector.extract_strided_slice %32 {offsets = [1, 0], sizes = [1, 512], strides = [1, 1]} : vector<8x512xf32> to vector<1x512xf32>
    %63 = vector.broadcast %61 : vector<8x1xf32> to vector<8x512xf32>
    %64 = vector.broadcast %62 : vector<1x512xf32> to vector<8x512xf32>
    %65 = arith.mulf %63, %64 : vector<8x512xf32>
    %66 = arith.addf %57, %65 : vector<8x512xf32>
    %67 = vector.extract_strided_slice %3 {offsets = [0, 2], sizes = [8, 1], strides = [1, 1]} : vector<8x8xf32> to vector<8x1xf32>
    %68 = vector.extract_strided_slice %49 {offsets = [2, 0], sizes = [1, 1], strides = [1, 1]} : vector<8x1xf32> to vector<1x1xf32>
    %69 = vector.broadcast %68 : vector<1x1xf32> to vector<8x1xf32>
    %70 = arith.mulf %67, %69 : vector<8x1xf32>
    %71 = vector.extract_strided_slice %32 {offsets = [2, 0], sizes = [1, 512], strides = [1, 1]} : vector<8x512xf32> to vector<1x512xf32>
    %72 = vector.broadcast %70 : vector<8x1xf32> to vector<8x512xf32>
    %73 = vector.broadcast %71 : vector<1x512xf32> to vector<8x512xf32>
    %74 = arith.mulf %72, %73 : vector<8x512xf32>
    %75 = arith.addf %66, %74 : vector<8x512xf32>
    %76 = vector.extract_strided_slice %3 {offsets = [0, 3], sizes = [8, 1], strides = [1, 1]} : vector<8x8xf32> to vector<8x1xf32>
    %77 = vector.extract_strided_slice %49 {offsets = [3, 0], sizes = [1, 1], strides = [1, 1]} : vector<8x1xf32> to vector<1x1xf32>
    %78 = vector.broadcast %77 : vector<1x1xf32> to vector<8x1xf32>
    %79 = arith.mulf %76, %78 : vector<8x1xf32>
    %80 = vector.extract_strided_slice %32 {offsets = [3, 0], sizes = [1, 512], strides = [1, 1]} : vector<8x512xf32> to vector<1x512xf32>
    %81 = vector.broadcast %79 : vector<8x1xf32> to vector<8x512xf32>
    %82 = vector.broadcast %80 : vector<1x512xf32> to vector<8x512xf32>
    %83 = arith.mulf %81, %82 : vector<8x512xf32>
    %84 = arith.addf %75, %83 : vector<8x512xf32>
    %85 = vector.extract_strided_slice %3 {offsets = [0, 4], sizes = [8, 1], strides = [1, 1]} : vector<8x8xf32> to vector<8x1xf32>
    %86 = vector.extract_strided_slice %49 {offsets = [4, 0], sizes = [1, 1], strides = [1, 1]} : vector<8x1xf32> to vector<1x1xf32>
    %87 = vector.broadcast %86 : vector<1x1xf32> to vector<8x1xf32>
    %88 = arith.mulf %85, %87 : vector<8x1xf32>
    %89 = vector.extract_strided_slice %32 {offsets = [4, 0], sizes = [1, 512], strides = [1, 1]} : vector<8x512xf32> to vector<1x512xf32>
    %90 = vector.broadcast %88 : vector<8x1xf32> to vector<8x512xf32>
    %91 = vector.broadcast %89 : vector<1x512xf32> to vector<8x512xf32>
    %92 = arith.mulf %90, %91 : vector<8x512xf32>
    %93 = arith.addf %84, %92 : vector<8x512xf32>
    %94 = vector.extract_strided_slice %3 {offsets = [0, 5], sizes = [8, 1], strides = [1, 1]} : vector<8x8xf32> to vector<8x1xf32>
    %95 = vector.extract_strided_slice %49 {offsets = [5, 0], sizes = [1, 1], strides = [1, 1]} : vector<8x1xf32> to vector<1x1xf32>
    %96 = vector.broadcast %95 : vector<1x1xf32> to vector<8x1xf32>
    %97 = arith.mulf %94, %96 : vector<8x1xf32>
    %98 = vector.extract_strided_slice %32 {offsets = [5, 0], sizes = [1, 512], strides = [1, 1]} : vector<8x512xf32> to vector<1x512xf32>
    %99 = vector.broadcast %97 : vector<8x1xf32> to vector<8x512xf32>
    %100 = vector.broadcast %98 : vector<1x512xf32> to vector<8x512xf32>
    %101 = arith.mulf %99, %100 : vector<8x512xf32>
    %102 = arith.addf %93, %101 : vector<8x512xf32>
    %103 = vector.extract_strided_slice %3 {offsets = [0, 6], sizes = [8, 1], strides = [1, 1]} : vector<8x8xf32> to vector<8x1xf32>
    %104 = vector.extract_strided_slice %49 {offsets = [6, 0], sizes = [1, 1], strides = [1, 1]} : vector<8x1xf32> to vector<1x1xf32>
    %105 = vector.broadcast %104 : vector<1x1xf32> to vector<8x1xf32>
    %106 = arith.mulf %103, %105 : vector<8x1xf32>
    %107 = vector.extract_strided_slice %32 {offsets = [6, 0], sizes = [1, 512], strides = [1, 1]} : vector<8x512xf32> to vector<1x512xf32>
    %108 = vector.broadcast %106 : vector<8x1xf32> to vector<8x512xf32>
    %109 = vector.broadcast %107 : vector<1x512xf32> to vector<8x512xf32>
    %110 = arith.mulf %108, %109 : vector<8x512xf32>
    %111 = arith.addf %102, %110 : vector<8x512xf32>
    %112 = vector.extract_strided_slice %3 {offsets = [0, 7], sizes = [8, 1], strides = [1, 1]} : vector<8x8xf32> to vector<8x1xf32>
    %113 = vector.extract_strided_slice %49 {offsets = [7, 0], sizes = [1, 1], strides = [1, 1]} : vector<8x1xf32> to vector<1x1xf32>
    %114 = vector.broadcast %113 : vector<1x1xf32> to vector<8x1xf32>
    %115 = arith.mulf %112, %114 : vector<8x1xf32>
    %116 = vector.extract_strided_slice %32 {offsets = [7, 0], sizes = [1, 512], strides = [1, 1]} : vector<8x512xf32> to vector<1x512xf32>
    %117 = vector.broadcast %115 : vector<8x1xf32> to vector<8x512xf32>
    %118 = vector.broadcast %116 : vector<1x512xf32> to vector<8x512xf32>
    %119 = arith.mulf %117, %118 : vector<8x512xf32>
    %120 = arith.addf %111, %119 : vector<8x512xf32>
    %cst_8 = arith.constant dense<0.000000e+00> : vector<8xf32>
    %121 = vector.multi_reduction <add>, %120, %cst_8 [1] : vector<8x512xf32> to vector<8xf32>
    %122 = vector.shape_cast %121 : vector<8xf32> to vector<8x1xf32>
    %123 = arith.mulf %120, %120 : vector<8x512xf32>
    %cst_9 = arith.constant dense<0.000000e+00> : vector<8xf32>
    %124 = vector.multi_reduction <add>, %123, %cst_9 [1] : vector<8x512xf32> to vector<8xf32>
    %125 = vector.shape_cast %124 : vector<8xf32> to vector<8x1xf32>
    %cst_10 = arith.constant 0.001953125 : f32
    %126 = vector.broadcast %cst_10 : f32 to vector<8x1xf32>
    %127 = arith.mulf %122, %126 : vector<8x1xf32>
    %cst_11 = arith.constant 0.001953125 : f32
    %128 = vector.broadcast %cst_11 : f32 to vector<8x1xf32>
    %129 = arith.mulf %125, %128 : vector<8x1xf32>
    %130 = arith.mulf %127, %127 : vector<8x1xf32>
    %131 = arith.subf %129, %130 : vector<8x1xf32>
    %cst_12 = arith.constant 0.000000e+00 : f32
    %132 = vector.broadcast %cst_12 : f32 to vector<8x1xf32>
    %133 = arith.maximumf %131, %132 : vector<8x1xf32>
    %cst_13 = arith.constant 9.99999974E-6 : f32
    %134 = vector.broadcast %cst_13 : f32 to vector<8x1xf32>
    %135 = arith.addf %133, %134 : vector<8x1xf32>
    %136 = math.rsqrt %135 : vector<8x1xf32>
    %137 = arith.mulf %6, %136 : vector<8x1xf32>
    %138 = arith.mulf %127, %137 : vector<8x1xf32>
    %139 = arith.subf %7, %138 : vector<8x1xf32>
    %140 = vector.broadcast %137 : vector<8x1xf32> to vector<8x512xf32>
    %141 = arith.mulf %120, %140 : vector<8x512xf32>
    %142 = vector.broadcast %139 : vector<8x1xf32> to vector<8x512xf32>
    %143 = arith.addf %141, %142 : vector<8x512xf32>
    %144 = vector.extract_strided_slice %4 {offsets = [0, 0], sizes = [8, 1], strides = [1, 1]} : vector<8x4xf32> to vector<8x1xf32>
    %145 = vector.extract_strided_slice %0 {offsets = [0, 0], sizes = [1, 512], strides = [1, 1]} : vector<4x512xf32> to vector<1x512xf32>
    %146 = vector.broadcast %144 : vector<8x1xf32> to vector<8x512xf32>
    %147 = vector.broadcast %145 : vector<1x512xf32> to vector<8x512xf32>
    %148 = arith.mulf %146, %147 : vector<8x512xf32>
    %149 = vector.extract_strided_slice %4 {offsets = [0, 1], sizes = [8, 1], strides = [1, 1]} : vector<8x4xf32> to vector<8x1xf32>
    %150 = vector.extract_strided_slice %0 {offsets = [1, 0], sizes = [1, 512], strides = [1, 1]} : vector<4x512xf32> to vector<1x512xf32>
    %151 = vector.broadcast %149 : vector<8x1xf32> to vector<8x512xf32>
    %152 = vector.broadcast %150 : vector<1x512xf32> to vector<8x512xf32>
    %153 = arith.mulf %151, %152 : vector<8x512xf32>
    %154 = arith.addf %148, %153 : vector<8x512xf32>
    %155 = vector.extract_strided_slice %4 {offsets = [0, 2], sizes = [8, 1], strides = [1, 1]} : vector<8x4xf32> to vector<8x1xf32>
    %156 = vector.extract_strided_slice %0 {offsets = [2, 0], sizes = [1, 512], strides = [1, 1]} : vector<4x512xf32> to vector<1x512xf32>
    %157 = vector.broadcast %155 : vector<8x1xf32> to vector<8x512xf32>
    %158 = vector.broadcast %156 : vector<1x512xf32> to vector<8x512xf32>
    %159 = arith.mulf %157, %158 : vector<8x512xf32>
    %160 = arith.addf %154, %159 : vector<8x512xf32>
    %161 = vector.extract_strided_slice %4 {offsets = [0, 3], sizes = [8, 1], strides = [1, 1]} : vector<8x4xf32> to vector<8x1xf32>
    %162 = vector.extract_strided_slice %0 {offsets = [3, 0], sizes = [1, 512], strides = [1, 1]} : vector<4x512xf32> to vector<1x512xf32>
    %163 = vector.broadcast %161 : vector<8x1xf32> to vector<8x512xf32>
    %164 = vector.broadcast %162 : vector<1x512xf32> to vector<8x512xf32>
    %165 = arith.mulf %163, %164 : vector<8x512xf32>
    %166 = arith.addf %160, %165 : vector<8x512xf32>
    %cst_14 = arith.constant dense<0.000000e+00> : vector<8xf32>
    %167 = vector.multi_reduction <add>, %166, %cst_14 [1] : vector<8x512xf32> to vector<8xf32>
    %168 = vector.shape_cast %167 : vector<8xf32> to vector<8x1xf32>
    %169 = arith.mulf %166, %166 : vector<8x512xf32>
    %cst_15 = arith.constant dense<0.000000e+00> : vector<8xf32>
    %170 = vector.multi_reduction <add>, %169, %cst_15 [1] : vector<8x512xf32> to vector<8xf32>
    %171 = vector.shape_cast %170 : vector<8xf32> to vector<8x1xf32>
    %cst_16 = arith.constant 0.001953125 : f32
    %172 = vector.broadcast %cst_16 : f32 to vector<8x1xf32>
    %173 = arith.mulf %168, %172 : vector<8x1xf32>
    %cst_17 = arith.constant 0.001953125 : f32
    %174 = vector.broadcast %cst_17 : f32 to vector<8x1xf32>
    %175 = arith.mulf %171, %174 : vector<8x1xf32>
    %176 = arith.mulf %173, %173 : vector<8x1xf32>
    %177 = arith.subf %175, %176 : vector<8x1xf32>
    %cst_18 = arith.constant 0.000000e+00 : f32
    %178 = vector.broadcast %cst_18 : f32 to vector<8x1xf32>
    %179 = arith.maximumf %177, %178 : vector<8x1xf32>
    %cst_19 = arith.constant 9.99999974E-6 : f32
    %180 = vector.broadcast %cst_19 : f32 to vector<8x1xf32>
    %181 = arith.addf %179, %180 : vector<8x1xf32>
    %182 = math.rsqrt %181 : vector<8x1xf32>
    %183 = arith.mulf %8, %182 : vector<8x1xf32>
    %184 = arith.mulf %173, %183 : vector<8x1xf32>
    %185 = arith.subf %9, %184 : vector<8x1xf32>
    %186 = vector.broadcast %183 : vector<8x1xf32> to vector<8x512xf32>
    %187 = arith.mulf %166, %186 : vector<8x512xf32>
    %188 = vector.broadcast %185 : vector<8x1xf32> to vector<8x512xf32>
    %189 = arith.addf %187, %188 : vector<8x512xf32>
    %190 = vector.extract_strided_slice %143 {offsets = [0, 0], sizes = [8, 128], strides = [1, 1]} : vector<8x512xf32> to vector<8x128xf32>
    %191 = vector.extract_strided_slice %143 {offsets = [0, 128], sizes = [8, 128], strides = [1, 1]} : vector<8x512xf32> to vector<8x128xf32>
    %192 = arith.maximumf %190, %191 : vector<8x128xf32>
    %193 = vector.extract_strided_slice %143 {offsets = [0, 256], sizes = [8, 128], strides = [1, 1]} : vector<8x512xf32> to vector<8x128xf32>
    %194 = vector.extract_strided_slice %143 {offsets = [0, 384], sizes = [8, 128], strides = [1, 1]} : vector<8x512xf32> to vector<8x128xf32>
    %195 = arith.maximumf %193, %194 : vector<8x128xf32>
    %196 = arith.maximumf %192, %195 : vector<8x128xf32>
    %cst_20 = arith.constant 1.000000e-01 : f32
    %197 = vector.broadcast %cst_20 : f32 to vector<8x128xf32>
    %198 = arith.mulf %197, %196 : vector<8x128xf32>
    %199 = arith.maximumf %196, %198 : vector<8x128xf32>
    %200 = vector.extract_strided_slice %189 {offsets = [0, 0], sizes = [8, 128], strides = [1, 1]} : vector<8x512xf32> to vector<8x128xf32>
    %201 = vector.extract_strided_slice %189 {offsets = [0, 128], sizes = [8, 128], strides = [1, 1]} : vector<8x512xf32> to vector<8x128xf32>
    %202 = arith.maximumf %200, %201 : vector<8x128xf32>
    %203 = vector.extract_strided_slice %189 {offsets = [0, 256], sizes = [8, 128], strides = [1, 1]} : vector<8x512xf32> to vector<8x128xf32>
    %204 = vector.extract_strided_slice %189 {offsets = [0, 384], sizes = [8, 128], strides = [1, 1]} : vector<8x512xf32> to vector<8x128xf32>
    %205 = arith.maximumf %203, %204 : vector<8x128xf32>
    %206 = arith.maximumf %202, %205 : vector<8x128xf32>
    %cst_21 = arith.constant 1.000000e-01 : f32
    %207 = vector.broadcast %cst_21 : f32 to vector<8x128xf32>
    %208 = arith.mulf %207, %206 : vector<8x128xf32>
    %209 = arith.maximumf %206, %208 : vector<8x128xf32>
    %210 = arith.addf %199, %209 : vector<8x128xf32>
    %c0_22 = arith.constant 0 : index
    %c0_23 = arith.constant 0 : index
    %211 = vector.load %arg3[%c0_22, %c0_23] : memref<8x128xf32, #tpu.memory_space<vmem>>, vector<8x128xf32>
    tpu.vector_store %arg3[%c0_22, %c0_23], %210 {strides = array<i32>} : memref<8x128xf32, #tpu.memory_space<vmem>>, vector<8x128xf32>,
    return
  }
  func.func @transform_0(%arg0: i32) -> (i32, i32) {
    %c0_i32 = arith.constant 0 : i32
    %c0_i32_0 = arith.constant 0 : i32
    %c0_i32_1 = arith.constant 0 : i32
    return %c0_i32, %c0_i32_0 : i32, i32
  }
  func.func @transform_1(%arg0: i32) -> (i32, i32) {
    %c0_i32 = arith.constant 0 : i32
    %c0_i32_0 = arith.constant 0 : i32
    %c0_i32_1 = arith.constant 0 : i32
    return %c0_i32, %c0_i32_0 : i32, i32
  }
  func.func @transform_2(%arg0: i32) -> (i32, i32) {
    %c0_i32 = arith.constant 0 : i32
    %c0_i32_0 = arith.constant 0 : i32
    %c0_i32_1 = arith.constant 0 : i32
    return %c0_i32, %c0_i32_0 : i32, i32
  }
}

</mosaic_0001>

<bundles_post_ra>
// kernel: resblock_pallas.1
= control target key start
LH: loop header
LB: loop body
LE: loop exit
PB: predicated region body
PF: predicated region fallthrough
CT: control target
= control target key end

     0   :  { %v735_v0 = vmov 0   ;;  %v736_v2 = vmov 2   ;;  %v737_v3 = vmov 1   ;;  %v738_v4 = vmov 3   ;;  %s742_s14 = smov 116   ;;  %s743_s15 = smov 118   ;;  %s1090_s1 = inlined_call_operand.vmem [shape: f32[8,21], index: 1, kind: input, shape index: {}]   ;;  %s1091_s0 = inlined_call_operand.vmem [shape: f32[4,512], index: 0, kind: input, shape index: {}]   ;;  %s1092_s2 = inlined_call_operand.vmem [shape: f32[8,128], index: 2, kind: output, shape index: {}]  }
   0x1   :  { %708 = vset.pattern.permute.xlu0 %v735_v0  ;;  %v782_v1 = vld [vmem:[%s1090_s1] sm:$0xff]  ;;  %710 = vset.pattern.permute.xlu1 %v736_v2  ;;  %v21_v5 = vlaneseq  ;;  %v12_v10 = vld [vmem:[%s1091_s0 + $0x8] sm:$0xff]  ;;  %s744_s16 = smov 119   ;;  %s745_s17 = smov 120  }
   0x2   :  { %1096 = vst [vmem:[#allocation2_spill] sm:$0xff] %v782_v1  ;;  %16 = vperm.xlu0 %708, %v782_v1   ;;  %110 = vperm.xlu1 %710, %v782_v1   ;;  %v11_v9 = vld [vmem:[%s1091_s0] sm:$0xff]  ;;  %s741_s0 = smov 117   ;;  %s746_s18 = smov 121  }
   0x3   :  { %v22_v6 = vshrl.u32 %v21_v5, 7  ;;  %s747_s19 = smov 122   ;;  %s748_s20 = smov 123  }
   0x4   :  { %s761_s21 = smov 1  }
   0x5   :  { %v788_v7 = vsub.s32 0, %v22_v6  ;;  %v790_v8 = vsub.s32 4, %v22_v6  ;;  %v798_v11 = vsub.s32 2, %v22_v6  ;;  %v800_v12 = vsub.s32 6, %v22_v6 }
   0x6   :  { %709 = vset.pattern.permute.xlu0 %v737_v3  ;;  %711 = vset.pattern.permute.xlu1 %v738_v4  ;;  %v802_v13 = vsub.s32 1, %v22_v6  ;;  %v804_v14 = vsub.s32 5, %v22_v6  ;;  %v806_v15 = vsub.s32 3, %v22_v6  ;;  %v808_v16 = vsub.s32 7, %v22_v6 }
   0x7   :  { %62 = vperm.xlu0 %709, %v782_v1   ;;  %158 = vperm.xlu1 %711, %v782_v1   ;;  %v24_v17 = vrot.slane %v11_v9, %v788_v7  ;;  %v28_v18 = vrot.slane %v11_v9, %v790_v8  ;;  %v32_v19 = vrot.slane %v12_v10, %v788_v7 }
   0x8   :  { %v36_v20 = vrot.slane %v12_v10, %v790_v8  ;;  %v116_v21 = vrot.slane %v11_v9, %v798_v11  ;;  %v120_v22 = vrot.slane %v11_v9, %v800_v12  ;;  %v124_v23 = vrot.slane %v12_v10, %v798_v11 }
   0x9   :  { %v68_v24 = vrot.slane %v11_v9, %v802_v13  ;;  %v72_v25 = vrot.slane %v11_v9, %v804_v14  ;;  %v76_v26 = vrot.slane %v12_v10, %v802_v13  ;;  %v80_v27 = vrot.slane %v12_v10, %v804_v14 }
   0xa   :  { %v128_v28 = vrot.slane %v12_v10, %v800_v12  ;;  %v164_v29 = vrot.slane %v11_v9, %v806_v15  ;;  %v168_v30 = vrot.slane %v11_v9, %v808_v16  ;;  %v172_v31 = vrot.slane %v12_v10, %v806_v15 }
   0xb   :  { %v826_v33 = vrot.slane %v24_v17, %v788_v7  ;;  %v829_v34 = vrot.slane %v28_v18, %v788_v7  ;;  %v832_v35 = vrot.slane %v32_v19, %v788_v7  ;;  %v176_v37 = vrot.slane %v12_v10, %v808_v16 }
   0xc   :  { %v836_v38 = vrot.slane %v36_v20, %v788_v7  ;;  %v839_v39 = vrot.slane %v116_v21, %v798_v11  ;;  %v842_v40 = vrot.slane %v120_v22, %v798_v11  ;;  %v845_v41 = vrot.slane %v124_v23, %v798_v11 }
   0xd   :  { %v848_v42 = vrot.slane %v68_v24, %v802_v13  ;;  %v851_v43 = vrot.slane %v72_v25, %v802_v13  ;;  %v854_v44 = vrot.slane %v76_v26, %v802_v13  ;;  %v857_v45 = vrot.slane %v80_v27, %v802_v13 }
   0xe   :  { %v860_v46 = vrot.slane %v128_v28, %v798_v11  ;;  %v863_v47 = vrot.slane %v164_v29, %v806_v15  ;;  %v866_v48 = vrot.slane %v168_v30, %v806_v15  ;;  %v869_v49 = vrot.slane %v172_v31, %v806_v15 }
   0xf   :  { %v875_v53 = vrot.slane %v176_v37, %v806_v15 }
  0x11   :  { %1097 = vst [vmem:[#allocation3_spill] sm:$0xff] %v875_v53 }
  0x7d   :  { %v17_v32 = vpop.permute.xlu0 %16  ;;  %v111_v36 = vpop.permute.xlu1 %110 }
  0x7e   :  { %v57_v50 = vmul.f32 %v826_v33, %v17_v32  ;;  %v58_v51 = vmul.f32 %v829_v34, %v17_v32  ;;  %v59_v52 = vmul.f32 %v832_v35, %v17_v32  ;;  %v60_v54 = vmul.f32 %v836_v38, %v17_v32 }
  0x7f   :  { %v149_v55 = vmul.f32 %v839_v39, %v111_v36  ;;  %v150_v56 = vmul.f32 %v842_v40, %v111_v36  ;;  %v151_v57 = vmul.f32 %v845_v41, %v111_v36  ;;  %v152_v0 = vmul.f32 %v860_v46, %v111_v36 }
  0x82   :  { %v63_v58 = vpop.permute.xlu0 %62  ;;  %v159_v59 = vpop.permute.xlu1 %158 }
  0x83   :  { %v101_v60 = vmul.f32 %v848_v42, %v63_v58  ;;  %v102_v61 = vmul.f32 %v851_v43, %v63_v58  ;;  %v103_v62 = vmul.f32 %v854_v44, %v63_v58  ;;  %v104_v63 = vmul.f32 %v857_v45, %v63_v58 }
  0x84   :  { %v197_v2 = vmul.f32 %v863_v47, %v159_v59  ;;  %v198_v3 = vmul.f32 %v866_v48, %v159_v59  ;;  %v199_v4 = vmul.f32 %v869_v49, %v159_v59  ;;  %v200_v17 = vmul.f32 %v875_v53, %v159_v59 }
  0x85   :  { %v105_v5 = vadd.f32 %v101_v60, %v57_v50  ;;  %v106_v6 = vadd.f32 %v102_v61, %v58_v51  ;;  %v107_v9 = vadd.f32 %v103_v62, %v59_v52  ;;  %v108_v10 = vadd.f32 %v104_v63, %v60_v54 }
  0x86   :  { %v739_v51 = vmov 12   ;;  %v740_v52 = vmov 13  }
  0x87   :  { %v153_v18 = vadd.f32 %v149_v55, %v105_v5  ;;  %v154_v19 = vadd.f32 %v150_v56, %v106_v6  ;;  %v155_v20 = vadd.f32 %v151_v57, %v107_v9  ;;  %v156_v21 = vadd.f32 %v152_v0, %v108_v10  ;;  %712 = vset.pattern.permute.xlu1 %v739_v51 }
  0x88   :  { %713 = vset.pattern.permute.xlu0 %v740_v52  ;;  %v754_v52 = vmov 7  }
  0x89   :  { %v890_v22 = vadd.f32 %v197_v2, %v153_v18  ;;  %v892_v23 = vadd.f32 %v198_v3, %v154_v19  ;;  %v894_v24 = vadd.f32 %v199_v4, %v155_v20  ;;  %v896_v25 = vadd.f32 %v200_v17, %v156_v21 }
  0x8a   :  { %v749_v17 = vmov 14   ;;  %v750_v18 = vmov 5   ;;  %v751_v19 = vmov 4  }
  0x8b   :  { %v205_v26 = vadd.f32 %v892_v23, %v890_v22  ;;  %v210_v27 = vmul.f32 %v890_v22, %v890_v22  ;;  %v211_v28 = vmul.f32 %v892_v23, %v892_v23  ;;  %v212_v30 = vmul.f32 %v894_v24, %v894_v24 }
  0x8c   :  { %v213_v36 = vmul.f32 %v896_v25, %v896_v25 }
  0x8d   :  { %v206_v29 = vadd.f32 %v205_v26, %v894_v24  ;;  %v214_v31 = vadd.f32 %v211_v28, %v210_v27 }
  0x8f   :  { %v207_v32 = vadd.f32 %v206_v29, %v896_v25  ;;  %v215_v37 = vadd.f32 %v214_v31, %v212_v30  ;;  %v752_v31 = vmov 6  }
  0x91   :  { %208 = vadd.xlane.f32.xlu1 %v207_v32  ;;  %v216_v50 = vadd.f32 %v215_v37, %v213_v36  ;;  %v753_v32 = vmov 8  }
  0x93   :  { %217 = vadd.xlane.f32.xlu0 %v216_v50 }
 0x11a   :  { %v209_v54 = vpop.xlane.xlu1 %208 }
 0x11b   :  { %v219_v55 = vmul.f32 0.001953125, %v209_v54 }
 0x11c   :  { %v218_v56 = vpop.xlane.xlu0 %217 }
 0x11d   :  { %v221_v57 = vmul.f32 %v219_v55, %v219_v55  ;;  %v220_v58 = vmul.f32 0.001953125, %v218_v56  ;;  %v755_v56 = vmov 11  }
 0x11f   :  { %v222_v59 = vsub.f32 %v220_v58, %v221_v57  ;;  %v756_v58 = vmov 9  }
 0x121   :  { %v223_v60 = vmax.f32 %v222_v59, 0.0 }
 0x123   :  { %v224_v61 = vadd.f32 1e-05, %v223_v60 }
 0x125   :  { %729 = vrsqrt.f32 %v224_v61  ;;  %v757_v61 = vmov 10  }
 0x132   :  { %v730_v62 = vpop.eup %729 }
 0x133   :  { %v226_v63 = vmul.f32 %v730_v62, %v782_v1  ;;  %v758_v62 = vmov 15  }
 0x135   :  { %v264_v0 = vrot.slane %v226_v63, %v802_v13  ;;  %v230_v2 = vrot.slane %v226_v63, %v788_v7  ;;  %v302_v3 = vrot.slane %v226_v63, %v798_v11  ;;  %v340_v4 = vrot.slane %v226_v63, %v806_v15 }
 0x136   :  { %v378_v5 = vrot.slane %v226_v63, %v790_v8  ;;  %v416_v6 = vrot.slane %v226_v63, %v804_v14  ;;  %v454_v9 = vrot.slane %v226_v63, %v800_v12  ;;  %v492_v10 = vrot.slane %v226_v63, %v808_v16 }
 0x137   :  { %266 = vrot.lane.b32.xlu1 %v264_v0, %s741_s0  ;;  %232 = vrot.lane.b32.xlu0 %v230_v2, %s742_s14 }
 0x13b   :  { %304 = vrot.lane.b32.xlu1 %v302_v3, %s743_s15  ;;  %342 = vrot.lane.b32.xlu0 %v340_v4, %s744_s16  ;;  %v244_v3 = vrot.slane %v890_v22, %v788_v7  ;;  %v248_v4 = vrot.slane %v892_v23, %v788_v7 }
 0x13f   :  { %380 = vrot.lane.b32.xlu1 %v378_v5, %s745_s17  ;;  %418 = vrot.lane.b32.xlu0 %v416_v6, %s746_s18  ;;  %v252_v5 = vrot.slane %v894_v24, %v788_v7  ;;  %v256_v6 = vrot.slane %v896_v25, %v788_v7 }
 0x143   :  { %456 = vrot.lane.b32.xlu1 %v454_v9, %s747_s19  ;;  %494 = vrot.lane.b32.xlu0 %v492_v10, %s748_s20  ;;  %v278_v9 = vrot.slane %v890_v22, %v802_v13  ;;  %v282_v10 = vrot.slane %v892_v23, %v802_v13 }
 0x147   :  { %574 = vperm.xlu1 %712, %v782_v1   ;;  %582 = vperm.xlu0 %713, %v782_v1  }
 0x14b   :  { %714 = vset.pattern.permute.xlu1 %v749_v17  ;;  %716 = vset.pattern.permute.xlu0 %v750_v18  ;;  %v286_v18 = vrot.slane %v894_v24, %v802_v13 }
 0x14c   :  { %594 = vperm.xlu1 %714, %v782_v1  }
 0x150   :  { %715 = vset.pattern.permute.xlu1 %v751_v19  ;;  %v290_v19 = vrot.slane %v896_v25, %v802_v13  ;;  %v400_v13 = vrot.slane %v894_v24, %v790_v8 }
 0x1a9   :  { %v267_v20 = vpop.permute.xlu1 %266  ;;  %v233_v21 = vpop.permute.xlu0 %232 }
 0x1aa   :  { %v269_v26 = vmul.f32 %v267_v20, %v782_v1  ;;  %v235_v27 = vmul.f32 %v233_v21, %v782_v1  ;;  %v316_v20 = vrot.slane %v890_v22, %v798_v11  ;;  %v320_v21 = vrot.slane %v892_v23, %v798_v11 }
 0x1ac   :  { %272 = vperm.xlu0 %716, %v269_v26   ;;  %238 = vperm.xlu1 %715, %v235_v27   ;;  %v324_v26 = vrot.slane %v894_v24, %v798_v11  ;;  %v328_v27 = vrot.slane %v896_v25, %v798_v11 }
 0x1ad   :  { %v305_v28 = vpop.permute.xlu1 %304  ;;  %v343_v29 = vpop.permute.xlu0 %342 }
 0x1ae   :  { %v307_v30 = vmul.f32 %v305_v28, %v782_v1  ;;  %v345_v51 = vmul.f32 %v343_v29, %v782_v1  ;;  %v392_v28 = vrot.slane %v890_v22, %v790_v8  ;;  %v396_v29 = vrot.slane %v892_v23, %v790_v8 }
 0x1b0   :  { %717 = vset.pattern.permute.xlu1 %v752_v31  ;;  %719 = vset.pattern.permute.xlu0 %v753_v32  ;;  %v354_v31 = vrot.slane %v890_v22, %v806_v15  ;;  %v358_v32 = vrot.slane %v892_v23, %v806_v15 }
 0x1b1   :  { %v381_v36 = vpop.permute.xlu1 %380  ;;  %310 = vperm.xlu1 %717, %v307_v30   ;;  %v419_v37 = vpop.permute.xlu0 %418 }
 0x1b2   :  { %v383_v50 = vmul.f32 %v381_v36, %v782_v1  ;;  %v421_v57 = vmul.f32 %v419_v37, %v782_v1  ;;  %v362_v37 = vrot.slane %v894_v24, %v806_v15 }
 0x1b4   :  { %386 = vperm.xlu0 %719, %v383_v50   ;;  %v366_v50 = vrot.slane %v896_v25, %v806_v15  ;;  %v430_v15 = vrot.slane %v890_v22, %v804_v14 }
 0x1b5   :  { %718 = vset.pattern.permute.xlu1 %v754_v52  ;;  %v495_v54 = vpop.permute.xlu0 %494  ;;  %v457_v59 = vpop.permute.xlu1 %456 }
 0x1b6   :  { %v497_v55 = vmul.f32 %v495_v54, %v782_v1  ;;  %348 = vperm.xlu1 %718, %v345_v51   ;;  %v459_v60 = vmul.f32 %v457_v59, %v782_v1 }
 0x1b8   :  { %722 = vset.pattern.permute.xlu0 %v755_v56 }
 0x1b9   :  { %500 = vperm.xlu0 %722, %v497_v55  }
 0x1ba   :  { %720 = vset.pattern.permute.xlu1 %v756_v58 }
 0x1bb   :  { %424 = vperm.xlu1 %720, %v421_v57  }
 0x1bf   :  { %721 = vset.pattern.permute.xlu1 %v757_v61 }
 0x1c0   :  { %462 = vperm.xlu1 %721, %v459_v60  }
 0x1c2   :  { %v575_v63 = vpop.permute.xlu1 %574  ;;  %v933_v2 = vpop.permute.xlu0 %582 }
 0x1c4   :  { %723 = vset.pattern.permute.xlu1 %v758_v62 }
 0x1c5   :  { %606 = vperm.xlu1 %723, %v782_v1  }
 0x1c7   :  { %v931_v0 = vpop.permute.xlu1 %594 }
 0x227   :  { %v239_v17 = vpop.permute.xlu1 %238  ;;  %v273_v7 = vpop.permute.xlu0 %272 }
 0x228   :  { %v257_v36 = vmul.f32 %v244_v3, %v239_v17  ;;  %v258_v11 = vmul.f32 %v248_v4, %v239_v17  ;;  %v259_v51 = vmul.f32 %v252_v5, %v239_v17  ;;  %v291_v52 = vmul.f32 %v278_v9, %v273_v7 }
 0x229   :  { %v292_v54 = vmul.f32 %v282_v10, %v273_v7  ;;  %v293_v55 = vmul.f32 %v286_v18, %v273_v7  ;;  %v260_v56 = vmul.f32 %v256_v6, %v239_v17  ;;  %v294_v61 = vmul.f32 %v290_v19, %v273_v7 }
 0x22a   :  { %v434_v5 = vrot.slane %v892_v23, %v804_v14  ;;  %v438_v6 = vrot.slane %v894_v24, %v804_v14  ;;  %v442_v9 = vrot.slane %v896_v25, %v804_v14  ;;  %v295_v10 = vadd.f32 %v291_v52, %v257_v36 }
 0x22b   :  { %v296_v17 = vadd.f32 %v292_v54, %v258_v11  ;;  %v297_v18 = vadd.f32 %v293_v55, %v259_v51  ;;  %v577_v19 = vmul.f32 %v575_v63, %v826_v33  ;;  %v298_v59 = vadd.f32 %v294_v61, %v260_v56 }
 0x22c   :  { %v311_v57 = vpop.permute.xlu1 %310  ;;  %v585_v33 = vmul.f32 %v933_v2, %v848_v42  ;;  %v586_v56 = vmul.f32 %v933_v2, %v851_v43  ;;  %v1098_v43 = vrot.slane %v896_v25, %v790_v8  ;;  %v597_v61 = vmul.f32 %v931_v0, %v839_v39 }
 0x22d   :  { %v329_v62 = vmul.f32 %v316_v20, %v311_v57  ;;  %v330_v3 = vmul.f32 %v320_v21, %v311_v57  ;;  %v331_v4 = vmul.f32 %v324_v26, %v311_v57  ;;  %v332_v60 = vmul.f32 %v328_v27, %v311_v57 }
 0x22e   :  { %v578_v20 = vmul.f32 %v575_v63, %v829_v34  ;;  %v579_v21 = vmul.f32 %v575_v63, %v832_v35  ;;  %v468_v26 = vrot.slane %v890_v22, %v800_v12  ;;  %v580_v27 = vmul.f32 %v575_v63, %v836_v38 }
 0x22f   :  { %v387_v7 = vpop.permute.xlu0 %386  ;;  %v333_v58 = vadd.f32 %v329_v62, %v295_v10  ;;  %v334_v30 = vadd.f32 %v330_v3, %v296_v17  ;;  %v335_v1 = vadd.f32 %v331_v4, %v297_v18  ;;  %v336_v34 = vadd.f32 %v332_v60, %v298_v59 }
 0x230   :  { %v405_v35 = vmul.f32 %v392_v28, %v387_v7  ;;  %v406_v52 = vmul.f32 %v396_v29, %v387_v7  ;;  %v472_v28 = vrot.slane %v892_v23, %v800_v12  ;;  %v598_v62 = vmul.f32 %v931_v0, %v842_v40 }
 0x231   :  { %v349_v53 = vpop.permute.xlu1 %348  ;;  %v599_v3 = vmul.f32 %v931_v0, %v845_v41  ;;  %v518_v40 = vrot.slane %v896_v25, %v808_v16  ;;  %v1099_v41 = vrot.slane %v890_v22, %v808_v16 }
 0x232   :  { %v367_v14 = vmul.f32 %v354_v31, %v349_v53  ;;  %v368_v36 = vmul.f32 %v358_v32, %v349_v53  ;;  %v369_v11 = vmul.f32 %v362_v37, %v349_v53  ;;  %v370_v51 = vmul.f32 %v366_v50, %v349_v53 }
 0x233   :  { %v587_v31 = vmul.f32 %v933_v2, %v854_v44  ;;  %v588_v53 = vmul.f32 %v933_v2, %v857_v45  ;;  %v407_v32 = vmul.f32 %v400_v13, %v387_v7  ;;  %v408_v44 = vmul.f32 %v1098_v43, %v387_v7 }
 0x234   :  { %v371_v54 = vadd.f32 %v367_v14, %v333_v58  ;;  %v372_v55 = vadd.f32 %v368_v36, %v334_v30  ;;  %v373_v57 = vadd.f32 %v369_v11, %v335_v1  ;;  %v374_v38 = vadd.f32 %v370_v51, %v336_v34  ;;  %v501_v8 = vpop.permute.xlu0 %500 }
 0x235   :  { %v589_v58 = vadd.f32 %v585_v33, %v577_v19  ;;  %v476_v45 = vrot.slane %v894_v24, %v800_v12  ;;  %v480_v2 = vrot.slane %v896_v25, %v800_v12  ;;  %v590_v13 = vadd.f32 %v586_v56, %v578_v20  ;;  %v1102_v56 = vld [vmem:[#allocation3_spill] sm:$0xff] }
 0x236   :  { %v425_v63 = vpop.permute.xlu1 %424  ;;  %v409_v37 = vadd.f32 %v405_v35, %v371_v54  ;;  %v410_v42 = vadd.f32 %v406_v52, %v372_v55  ;;  %v411_v29 = vadd.f32 %v407_v32, %v373_v57  ;;  %v591_v59 = vadd.f32 %v587_v31, %v579_v21 }
 0x237   :  { %v443_v30 = vmul.f32 %v430_v15, %v425_v63  ;;  %v444_v1 = vmul.f32 %v434_v5, %v425_v63  ;;  %v445_v50 = vmul.f32 %v438_v6, %v425_v63  ;;  %v592_v60 = vadd.f32 %v588_v53, %v580_v27 }
 0x238   :  { %v412_v4 = vadd.f32 %v408_v44, %v374_v38  ;;  %v446_v15 = vmul.f32 %v442_v9, %v425_v63  ;;  %v600_v5 = vmul.f32 %v931_v0, %v860_v46  ;;  %v601_v21 = vadd.f32 %v597_v61, %v589_v58 }
 0x239   :  { %v447_v6 = vadd.f32 %v443_v30, %v409_v37  ;;  %v448_v12 = vadd.f32 %v444_v1, %v410_v42  ;;  %v449_v10 = vadd.f32 %v445_v50, %v411_v29  ;;  %v519_v7 = vmul.f32 %v1099_v41, %v501_v8 }
 0x23a   :  { %v1100_v9 = vrot.slane %v892_v23, %v808_v16  ;;  %v450_v0 = vadd.f32 %v446_v15, %v412_v4  ;;  %v603_v51 = vadd.f32 %v599_v3, %v591_v59  ;;  %v604_v27 = vadd.f32 %v600_v5, %v592_v60 }
 0x23b   :  { %v463_v17 = vpop.permute.xlu1 %462  ;;  %v1101_v33 = vrot.slane %v894_v24, %v808_v16  ;;  %v522_v25 = vmul.f32 %v518_v40, %v501_v8  ;;  %v759_v3 = vmov 17  }
 0x23c   :  { %v481_v18 = vmul.f32 %v468_v26, %v463_v17  ;;  %v482_v19 = vmul.f32 %v472_v28, %v463_v17  ;;  %v483_v20 = vmul.f32 %v476_v45, %v463_v17  ;;  %v484_v39 = vmul.f32 %v480_v2, %v463_v17  ;;  %724 = vset.pattern.permute.xlu1 %v759_v3 }
 0x23d   :  { %v520_v46 = vmul.f32 %v1100_v9, %v501_v8  ;;  %v602_v26 = vadd.f32 %v598_v62, %v590_v13  ;;  %v521_v34 = vmul.f32 %v1101_v33, %v501_v8  ;;  %v760_v8 = vmov 19  }
 0x23e   :  { %v485_v14 = vadd.f32 %v481_v18, %v447_v6  ;;  %v486_v36 = vadd.f32 %v482_v19, %v448_v12  ;;  %v487_v11 = vadd.f32 %v483_v20, %v449_v10  ;;  %v488_v35 = vadd.f32 %v484_v39, %v450_v0  ;;  %725 = vset.pattern.permute.xlu0 %v760_v8  ;;  %v1103_v0 = vld [vmem:[#allocation2_spill] sm:$0xff] }
 0x23f   :  { %v763_v33 = vmov 20  }
 0x240   :  { %v1031_v52 = vadd.f32 %v519_v7, %v485_v14  ;;  %v1033_v22 = vadd.f32 %v520_v46, %v486_v36  ;;  %v607_v54 = vpop.permute.xlu1 %606  ;;  %v1039_v53 = vadd.f32 %v521_v34, %v487_v11 }
 0x241   :  { %v609_v23 = vmul.f32 %v607_v54, %v863_v47  ;;  %v610_v55 = vmul.f32 %v607_v54, %v866_v48  ;;  %v611_v57 = vmul.f32 %v607_v54, %v869_v49  ;;  %v612_v31 = vmul.f32 %v607_v54, %v1102_v56 }
 0x242   :  { %v527_v16 = vadd.f32 %v1033_v22, %v1031_v52  ;;  %v532_v24 = vmul.f32 %v1031_v52, %v1031_v52  ;;  %v533_v32 = vmul.f32 %v1033_v22, %v1033_v22  ;;  %v1053_v49 = vadd.f32 %v522_v25, %v488_v35 }
 0x243   :  { %v1047_v38 = vadd.f32 %v609_v23, %v601_v21  ;;  %v1049_v47 = vadd.f32 %v610_v55, %v602_v26  ;;  %v1051_v48 = vadd.f32 %v611_v57, %v603_v51  ;;  %v1056_v37 = vadd.f32 %v612_v31, %v604_v27 }
 0x244   :  { %v528_v63 = vadd.f32 %v527_v16, %v1039_v53  ;;  %v536_v30 = vadd.f32 %v533_v32, %v532_v24  ;;  %v534_v44 = vmul.f32 %v1039_v53, %v1039_v53  ;;  %v535_v61 = vmul.f32 %v1053_v49, %v1053_v49 }
 0x245   :  { %v617_v42 = vadd.f32 %v1049_v47, %v1047_v38  ;;  %v622_v28 = vmul.f32 %v1047_v38, %v1047_v38  ;;  %v623_v29 = vmul.f32 %v1049_v47, %v1049_v47  ;;  %v624_v58 = vmul.f32 %v1051_v48, %v1051_v48 }
 0x246   :  { %v529_v1 = vadd.f32 %v528_v63, %v1053_v49  ;;  %v625_v2 = vmul.f32 %v1056_v37, %v1056_v37  ;;  %v537_v59 = vadd.f32 %v536_v30, %v534_v44  ;;  %v762_v27 = vmov 18  }
 0x247   :  { %v618_v50 = vadd.f32 %v617_v42, %v1051_v48  ;;  %v626_v43 = vadd.f32 %v623_v29, %v622_v28 }
 0x248   :  { %530 = vadd.xlane.f32.xlu1 %v529_v1  ;;  %v538_v62 = vadd.f32 %v537_v59, %v535_v61 }
 0x249   :  { %v619_v45 = vadd.f32 %v618_v50, %v1056_v37  ;;  %v627_v13 = vadd.f32 %v626_v43, %v624_v58 }
 0x24b   :  { %620 = vadd.xlane.f32.xlu0 %v619_v45  ;;  %v628_v60 = vadd.f32 %v627_v13, %v625_v2 }
 0x24d   :  { %629 = vadd.xlane.f32.xlu1 %v628_v60 }
 0x24f   :  { %539 = vadd.xlane.f32.xlu0 %v538_v62 }
 0x2d1   :  { %v531_v4 = vpop.xlane.xlu1 %530 }
 0x2d2   :  { %v541_v5 = vmul.f32 0.001953125, %v531_v4 }
 0x2d4   :  { %v621_v15 = vpop.xlane.xlu0 %620  ;;  %v543_v19 = vmul.f32 %v541_v5, %v541_v5 }
 0x2d5   :  { %v631_v6 = vmul.f32 0.001953125, %v621_v15 }
 0x2d6   :  { %v630_v12 = vpop.xlane.xlu1 %629 }
 0x2d7   :  { %v633_v10 = vmul.f32 %v631_v6, %v631_v6  ;;  %v632_v17 = vmul.f32 0.001953125, %v630_v12 }
 0x2d8   :  { %v540_v18 = vpop.xlane.xlu0 %539 }
 0x2d9   :  { %v634_v20 = vsub.f32 %v632_v17, %v633_v10  ;;  %v542_v39 = vmul.f32 0.001953125, %v540_v18 }
 0x2db   :  { %v635_v21 = vmax.f32 %v634_v20, 0.0  ;;  %v544_v40 = vsub.f32 %v542_v39, %v543_v19 }
 0x2dd   :  { %v636_v41 = vadd.f32 1e-05, %v635_v21  ;;  %v545_v7 = vmax.f32 %v544_v40, 0.0 }
 0x2df   :  { %731 = vrsqrt.f32 %v636_v41  ;;  %v546_v9 = vadd.f32 1e-05, %v545_v7 }
 0x2e1   :  { %733 = vrsqrt.f32 %v546_v9 }
 0x2ec   :  { %v732_v46 = vpop.eup %731 }
 0x2ed   :  { %v638_v14 = vmul.f32 %v732_v46, %v1103_v0 }
 0x2ee   :  { %v734_v36 = vpop.eup %733 }
 0x2ef   :  { %v639_v11 = vmul.f32 %v638_v14, %v631_v6  ;;  %v548_v26 = vmul.f32 %v734_v36, %v1103_v0 }
 0x2f1   :  { %641 = vrot.lane.b32.xlu1 %v639_v11, %s761_s21  ;;  %v549_v51 = vmul.f32 %v548_v26, %v541_v5 }
 0x2f3   :  { %551 = vrot.lane.b32.xlu0 %v549_v51, %s761_s21 }
 0x2f5   :  { %557 = vperm.xlu1 %724, %v548_v26  }
 0x2f7   :  { %647 = vperm.xlu0 %725, %v638_v14  }
 0x2f9   :  { %726 = vset.pattern.permute.xlu1 %v762_v27 }
 0x2fb   :  { %728 = vset.pattern.permute.xlu0 %v763_v33 }
 0x363   :  { %v642_v35 = vpop.permute.xlu1 %641 }
 0x364   :  { %v644_v54 = vsub.f32 %v1103_v0, %v642_v35 }
 0x365   :  { %v552_v34 = vpop.permute.xlu0 %551 }
 0x366   :  { %v554_v25 = vsub.f32 %v1103_v0, %v552_v34 }
 0x368   :  { %566 = vperm.xlu1 %726, %v554_v25  }
 0x36c   :  { %727 = vset.pattern.permute.xlu1 %v763_v33 }
 0x36d   :  { %656 = vperm.xlu1 %727, %v644_v54  }
 0x370   :  { %v558_v23 = vpop.permute.xlu1 %557 }
 0x371   :  { %v560_v55 = vmul.f32 %v558_v23, %v1031_v52  ;;  %v561_v57 = vmul.f32 %v558_v23, %v1033_v22  ;;  %v562_v56 = vmul.f32 %v558_v23, %v1039_v53  ;;  %v563_v31 = vmul.f32 %v558_v23, %v1053_v49 }
 0x372   :  { %v648_v24 = vpop.permute.xlu0 %647 }
 0x373   :  { %v650_v1 = vmul.f32 %v648_v24, %v1047_v38  ;;  %v651_v50 = vmul.f32 %v648_v24, %v1049_v47  ;;  %v652_v52 = vmul.f32 %v648_v24, %v1051_v48  ;;  %v653_v22 = vmul.f32 %v648_v24, %v1056_v37 }
 0x3e3   :  { %v567_v16 = vpop.permute.xlu1 %566 }
 0x3e4   :  { %v569_v32 = vadd.f32 %v567_v16, %v560_v55  ;;  %v570_v63 = vadd.f32 %v567_v16, %v561_v57  ;;  %v571_v42 = vadd.f32 %v567_v16, %v562_v56  ;;  %v572_v28 = vadd.f32 %v567_v16, %v563_v31 }
 0x3e6   :  { %v663_v29 = vmax.f32 %v569_v32, %v570_v63  ;;  %v664_v30 = vmax.f32 %v571_v42, %v572_v28 }
 0x3e8   :  { %v665_v58 = vmax.f32 %v663_v29, %v664_v30  ;;  %v657_v53 = vpop.permute.xlu1 %656 }
 0x3e9   :  { %v659_v43 = vadd.f32 %v657_v53, %v650_v1  ;;  %v660_v49 = vadd.f32 %v657_v53, %v651_v50  ;;  %v661_v44 = vadd.f32 %v657_v53, %v652_v52  ;;  %v662_v45 = vadd.f32 %v657_v53, %v653_v22 }
 0x3ea   :  { %v666_v59 = vmul.f32 0.1, %v665_v58 }
 0x3eb   :  { %v668_v2 = vmax.f32 %v659_v43, %v660_v49  ;;  %v669_v13 = vmax.f32 %v661_v44, %v662_v45 }
 0x3ec   :  { %v667_v62 = vmax.f32 %v665_v58, %v666_v59 }
 0x3ed   :  { %v670_v60 = vmax.f32 %v668_v2, %v669_v13 }
 0x3ef   :  { %v671_v61 = vmul.f32 0.1, %v670_v60 }
 0x3f1   :  { %v672_v3 = vmax.f32 %v670_v60, %v671_v61 }
 0x3f3   :  { %v673_v38 = vadd.f32 %v672_v3, %v667_v62 }
 0x3f5   :  { %674 = vst [vmem:[%s1092_s2] sm:$0xff] %v673_v38 }

</bundles_post_ra>
